<compile_context>
chip_gen: v5e
topology: v5e:2x2
jax: 0.10.0
libtpu: 0.0.40
codegen_flags: <defaults>
</compile_context>

<pallas_src>
import functools

import jax
import jax.numpy as jnp
from jax import lax
from jax.experimental import pallas as pl
from jax.experimental.pallas import tpu as pltpu

LN_EPS = 1e-5                    # PyTorch nn.LayerNorm default
VMEM_LIMIT = 32 * 1024 * 1024    # safe on v5e/v6e/v7x
MLP_CHUNK = 512                  # hidden-dim tile for fc1/fc2


def _ceil_to(x, m):
    return -(-x // m) * m


def _ln(x, g, b):
    mu = jnp.mean(x, axis=-1, keepdims=True)
    var = jnp.mean((x - mu) ** 2, axis=-1, keepdims=True)
    return (x - mu) * lax.rsqrt(var + LN_EPS) * g + b


# ----------------------------- Pallas kernels ------------------------------

def _patch_embed_kernel(x_ref, w_ref, o_ref):
    # bf16 x bf16 -> f32 accumulate on the MXU (Conv2d has bias=False).
    o_ref[...] = jnp.dot(x_ref[...], w_ref[...],
                         preferred_element_type=jnp.float32)


def patch_embed(patches_bf16, w_bf16):
    M, K = patches_bf16.shape
    _, N = w_bf16.shape
    tm = min(512, _ceil_to(M, 8))
    Mp = _ceil_to(M, tm)
    if Mp != M:
        patches_bf16 = jnp.pad(patches_bf16, ((0, Mp - M), (0, 0)))
    out = pl.pallas_call(
        _patch_embed_kernel,
        out_shape=jax.ShapeDtypeStruct((Mp, N), jnp.float32),
        grid=(Mp // tm,),
        in_specs=[pl.BlockSpec((tm, K), lambda i: (i, 0)),
                  pl.BlockSpec((K, N), lambda i: (0, 0))],
        out_specs=pl.BlockSpec((tm, N), lambda i: (i, 0)),
        compiler_params=pltpu.CompilerParams(
            dimension_semantics=("parallel",),
            vmem_limit_bytes=VMEM_LIMIT),
    )(patches_bf16, w_bf16)
    return out[:M]


def _block_kernel(n_heads, x_ref, ln1g_ref, ln1b_ref, mix_ref,
                  ln2g_ref, ln2b_ref, w1_ref, b1_ref, w2_ref, b2_ref, o_ref):
    """Fused SPECTRE block, one batch element's [Spad, D] slab per grid step."""
    S, D = x_ref.shape[1], x_ref.shape[2]
    hd = D // n_heads
    x = x_ref[0].astype(jnp.float32)                               # [S, D] f32

    # ---- LN1 + per-head spectral mix (only the head's own columns) ----
    xn = _ln(x, ln1g_ref[...], ln1b_ref[...]).astype(jnp.bfloat16)
    heads = []
    for h in range(n_heads):                                       # static loop
        heads.append(jnp.dot(mix_ref[h], xn[:, h * hd:(h + 1) * hd],
                             preferred_element_type=jnp.float32))
    x = x + jnp.concatenate(heads, axis=-1)                        # residual 1

    # ---- LN2 + MLP, hidden dimension tiled ----
    yn = _ln(x, ln2g_ref[...], ln2b_ref[...]).astype(jnp.bfloat16)
    Hd = w1_ref.shape[1]
    acc = jnp.zeros((S, D), jnp.float32)
    for c0 in range(0, Hd, MLP_CHUNK):                             # static loop
        c1 = min(c0 + MLP_CHUNK, Hd)
        h1 = jnp.dot(yn, w1_ref[:, c0:c1],
                     preferred_element_type=jnp.float32) + b1_ref[:, c0:c1]
        h1 = jax.nn.gelu(h1, approximate=True)                     # tanh -> EUP
        acc = acc + jnp.dot(h1.astype(jnp.bfloat16), w2_ref[c0:c1, :],
                            preferred_element_type=jnp.float32)
    o_ref[0] = (x + acc + b2_ref[...]).astype(o_ref.dtype)         # residual 2


def spectre_block(x, ln1g, ln1b, mix, ln2g, ln2b, w1, b1, w2, b2, n_heads):
    B, Spad, D = x.shape
    H = mix.shape[0]
    Hd = w1.shape[1]
    const2 = lambda i: (0, 0)
    return pl.pallas_call(
        functools.partial(_block_kernel, n_heads),
        out_shape=jax.ShapeDtypeStruct((B, Spad, D), jnp.bfloat16),
        grid=(B,),
        in_specs=[pl.BlockSpec((1, Spad, D), lambda i: (i, 0, 0)),
                  pl.BlockSpec((1, D), const2),
                  pl.BlockSpec((1, D), const2),
                  pl.BlockSpec((H, Spad, Spad), lambda i: (0, 0, 0)),
                  pl.BlockSpec((1, D), const2),
                  pl.BlockSpec((1, D), const2),
                  pl.BlockSpec((D, Hd), const2),
                  pl.BlockSpec((1, Hd), const2),
                  pl.BlockSpec((Hd, D), const2),
                  pl.BlockSpec((1, D), const2)],
        out_specs=pl.BlockSpec((1, Spad, D), lambda i: (i, 0, 0)),
        compiler_params=pltpu.CompilerParams(
            dimension_semantics=("parallel",),
            vmem_limit_bytes=VMEM_LIMIT),
    )(x, ln1g.reshape(1, D), ln1b.reshape(1, D), mix,
      ln2g.reshape(1, D), ln2b.reshape(1, D),
      w1, b1.reshape(1, Hd), w2, b2.reshape(1, D))


def _head_kernel(x_ref, g_ref, b_ref, w_ref, bw_ref, o_ref):
    """Fused final LayerNorm + classifier on the cls tokens (tiny)."""
    x = x_ref[...].astype(jnp.float32)
    xn = _ln(x, g_ref[...], b_ref[...])
    o_ref[...] = jnp.dot(xn, w_ref[...],
                         preferred_element_type=jnp.float32) + bw_ref[...]


def head_classifier(cls_x, g, b, w, bias):
    B, D = cls_x.shape
    N = w.shape[1]
    return pl.pallas_call(
        _head_kernel,
        out_shape=jax.ShapeDtypeStruct((B, N), jnp.float32),
        grid=(1,),
        in_specs=[pl.BlockSpec((B, D), lambda i: (0, 0)),
                  pl.BlockSpec((1, D), lambda i: (0, 0)),
                  pl.BlockSpec((1, D), lambda i: (0, 0)),
                  pl.BlockSpec((D, N), lambda i: (0, 0)),
                  pl.BlockSpec((1, N), lambda i: (0, 0))],
        out_specs=pl.BlockSpec((B, N), lambda i: (0, 0)),
    )(cls_x, g.reshape(1, D), b.reshape(1, D), w, bias.reshape(1, N))


# ------------------------ trace-time operator prep -------------------------

def build_mix_matrices(gre, gim, fre, fim, ire, iim, s_pad):
    """Collapse DFT -> diag(gate) -> IDFT (real part) into one real SxS matrix
    per (layer, head): M = Re(F^-1 diag(g) F).  gre/gim: [L, S, n_heads]."""
    g_re = jnp.swapaxes(gre, 1, 2)[..., None]          # [L, H, S, 1]
    g_im = jnp.swapaxes(gim, 1, 2)[..., None]
    a_re = g_re * fre - g_im * fim                     # [L, H, S, S]
    a_im = g_re * fim + g_im * fre
    hi = jax.lax.Precision.HIGHEST
    m = (jnp.einsum("st,lhto->lhso", ire, a_re, precision=hi)
         - jnp.einsum("st,lhto->lhso", iim, a_im, precision=hi))
    pad = s_pad - fre.shape[0]
    m = jnp.pad(m, ((0, 0), (0, 0), (0, pad), (0, pad)))
    return m.astype(jnp.bfloat16)                      # bf16 MXU operands


# --------------------------- parameters & model ----------------------------

def init_params(key, *, img_size, patch_size, in_chans, num_classes,
                embed_dim, depth, n_heads, mlp_ratio):
    num_patches = (img_size // patch_size) ** 2
    S = num_patches + 1
    D = embed_dim
    hidden = mlp_ratio * D
    keys = jax.random.split(key, 4 + depth)
    p = {}
    # Conv2d(kernel=stride=patch, bias=False) == matmul over flattened patches.
    p["patch_w"] = 0.02 * jax.random.normal(
        keys[0], (in_chans * patch_size * patch_size, D), jnp.float32)
    p["cls"] = 0.02 * jax.random.normal(keys[1], (1, 1, D), jnp.float32)
    p["pos"] = 0.02 * jax.random.normal(keys[2], (1, S, D), jnp.float32)
    p["head_w"] = 0.02 * jax.random.normal(keys[3], (D, num_classes), jnp.float32)
    p["head_b"] = jnp.zeros((num_classes,), jnp.float32)
    p["norm_g"] = jnp.ones((D,), jnp.float32)
    p["norm_b"] = jnp.zeros((D,), jnp.float32)
    blocks = []
    for i in range(depth):
        bk = jax.random.split(keys[4 + i], 4)
        blocks.append(dict(
            ln1_g=jnp.ones((D,), jnp.float32), ln1_b=jnp.zeros((D,), jnp.float32),
            ln2_g=jnp.ones((D,), jnp.float32), ln2_b=jnp.zeros((D,), jnp.float32),
            # per-(frequency, head) complex gates
            gre=1.0 + 0.05 * jax.random.normal(bk[0], (S, n_heads), jnp.float32),
            gim=0.05 * jax.random.normal(bk[1], (S, n_heads), jnp.float32),
            fc1_w=0.02 * jax.random.normal(bk[2], (D, hidden), jnp.float32),
            fc1_b=jnp.zeros((hidden,), jnp.float32),
            fc2_w=0.02 * jax.random.normal(bk[3], (hidden, D), jnp.float32),
            fc2_b=jnp.zeros((D,), jnp.float32),
        ))
    p["blocks"] = blocks
    return p


def spectre_vit_forward(params, x_nchw, *, patch_size, n_heads):
    B, C, H, W = x_nchw.shape
    pp = patch_size
    gh, gw = H // pp, W // pp
    D = params["patch_w"].shape[1]

    # PatchEmbed: im2col reshape (XLA glue) + Pallas matmul kernel.
    patches = (x_nchw.reshape(B, C, gh, pp, gw, pp)
               .transpose(0, 2, 4, 1, 3, 5)
               .reshape(B * gh * gw, C * pp * pp)).astype(jnp.bfloat16)
    tok = patch_embed(patches,
                      params["patch_w"].astype(jnp.bfloat16)).reshape(B, gh * gw, D)

    # cls token + positional embedding (f32), then pad S to a multiple of 8
    # and switch the residual stream to bf16 for the block stack.
    cls = jnp.broadcast_to(params["cls"], (B, 1, D))
    x = jnp.concatenate([cls, tok], axis=1) + params["pos"]        # [B, S, D]
    S = x.shape[1]
    s_pad = _ceil_to(S, 8)
    x = jnp.pad(x, ((0, 0), (0, s_pad - S), (0, 0))).astype(jnp.bfloat16)

    # DFT / inverse-DFT matrices for the real sequence length (shared), and
    # all blocks' mixing matrices built once (hoisted out of the layer loop).
    n = jnp.arange(S, dtype=jnp.float32)
    ang = -2.0 * jnp.pi * jnp.outer(n, n) / S
    fre, fim = jnp.cos(ang), jnp.sin(ang)
    ire, iim = fre / S, -fim / S
    gre_all = jnp.stack([blk["gre"] for blk in params["blocks"]])
    gim_all = jnp.stack([blk["gim"] for blk in params["blocks"]])
    mix_all = build_mix_matrices(gre_all, gim_all, fre, fim, ire, iim, s_pad)

    for li, blk in enumerate(params["blocks"]):
        x = spectre_block(
            x, blk["ln1_g"], blk["ln1_b"], mix_all[li],
            blk["ln2_g"], blk["ln2_b"],
            blk["fc1_w"].astype(jnp.bfloat16), blk["fc1_b"],
            blk["fc2_w"].astype(jnp.bfloat16), blk["fc2_b"],
            n_heads)

    cls_out = x[:, 0]                                              # [B, D] bf16
    return head_classifier(cls_out, params["norm_g"], params["norm_b"],
                           params["head_w"], params["head_b"])


if __name__ == "__main__":
    key = jax.random.PRNGKey(0)
    B, C, IMG = 2, 3, 16
    PATCH, EMBED, DEPTH, HEADS, MLP_RATIO, NUM_CLASSES = 4, 32, 2, 2, 4, 10

    pkey, xkey = jax.random.split(key)
    params = init_params(pkey, img_size=IMG, patch_size=PATCH, in_chans=C,
                         num_classes=NUM_CLASSES, embed_dim=EMBED, depth=DEPTH,
                         n_heads=HEADS, mlp_ratio=MLP_RATIO)
    x = jax.random.normal(xkey, (B, C, IMG, IMG), jnp.float32)

    fwd = jax.jit(functools.partial(spectre_vit_forward,
                                    patch_size=PATCH, n_heads=HEADS))
    out = fwd(params, x)
    jax.block_until_ready(out)
    assert out.shape == (B, NUM_CLASSES)
    assert bool(jnp.all(jnp.isfinite(out)))
    print("KERNEL_OK")
</pallas_src>

<mosaic_0001>
module attributes {stable_mosaic.version = 11 : i64} {
  func.func @_patch_embed_kernel(%arg0: i32, %arg1: memref<32x48xbf16, #tpu.memory_space<vmem>>, %arg2: memref<48x32xbf16, #tpu.memory_space<vmem>>, %arg3: memref<32x32xf32, #tpu.memory_space<vmem>>) attributes {dimension_semantics = [#tpu.dimension_semantics<parallel>], iteration_bounds = array<i64: 1>, scalar_prefetch = 0 : i64, scratch_operands = 0 : i64, tpu.core_type = #tpu.core_type<tc>, window_params = [{transform_indices = @transform_0, window_bounds = array<i64: 32, 48>}, {pipeline_mode = #tpu.pipeline_mode<synchronous>, transform_indices = @transform_1, window_bounds = array<i64: 48, 32>}, {transform_indices = @transform_2, window_bounds = array<i64: 32, 32>}]} {
    %c0 = arith.constant 0 : index
    %c0_0 = arith.constant 0 : index
    %0 = vector.load %arg1[%c0, %c0_0] : memref<32x48xbf16, #tpu.memory_space<vmem>>, vector<32x48xbf16>
    %c0_1 = arith.constant 0 : index
    %c0_2 = arith.constant 0 : index
    %1 = vector.load %arg2[%c0_1, %c0_2] : memref<48x32xbf16, #tpu.memory_space<vmem>>, vector<48x32xbf16>
    %cst = arith.constant dense<0.000000e+00> : vector<32x32xf32>
    %2 = tpu.matmul %0, %1, %cst {dimension_numbers = #tpu.dot_dimension_numbers<[1], [0], [0], [1], [0, 0, 1, 1], [], []>} : vector<32x48xbf16>, vector<48x32xbf16>, vector<32x32xf32> -> vector<32x32xf32>
    %c0_3 = arith.constant 0 : index
    %c0_4 = arith.constant 0 : index
    %3 = vector.load %arg3[%c0_3, %c0_4] : memref<32x32xf32, #tpu.memory_space<vmem>>, vector<32x32xf32>
    tpu.vector_store %arg3[%c0_3, %c0_4], %2 {strides = array<i32>} : memref<32x32xf32, #tpu.memory_space<vmem>>, vector<32x32xf32>,
    return
  }
  func.func @transform_0(%arg0: i32) -> (i32, i32) {
    %c0_i32 = arith.constant 0 : i32
    %c0_i32_0 = arith.constant 0 : i32
    return %arg0, %c0_i32 : i32, i32
  }
  func.func @transform_1(%arg0: i32) -> (i32, i32) {
    %c0_i32 = arith.constant 0 : i32
    %c0_i32_0 = arith.constant 0 : i32
    %c0_i32_1 = arith.constant 0 : i32
    return %c0_i32, %c0_i32_0 : i32, i32
  }
  func.func @transform_2(%arg0: i32) -> (i32, i32) {
    %c0_i32 = arith.constant 0 : i32
    %c0_i32_0 = arith.constant 0 : i32
    return %arg0, %c0_i32 : i32, i32
  }
}

module attributes {stable_mosaic.version = 11 : i64} {
  func.func @_head_kernel(%arg0: i32, %arg1: memref<2x32xbf16, #tpu.memory_space<vmem>>, %arg2: memref<1x32xf32, #tpu.memory_space<vmem>>, %arg3: memref<1x32xf32, #tpu.memory_space<vmem>>, %arg4: memref<32x10xf32, #tpu.memory_space<vmem>>, %arg5: memref<1x10xf32, #tpu.memory_space<vmem>>, %arg6: memref<2x10xf32, #tpu.memory_space<vmem>>) attributes {dimension_semantics = [#tpu.dimension_semantics<arbitrary>], iteration_bounds = array<i64: 1>, scalar_prefetch = 0 : i64, scratch_operands = 0 : i64, tpu.core_type = #tpu.core_type<tc>, window_params = [{pipeline_mode = #tpu.pipeline_mode<synchronous>, transform_indices = @transform_0, window_bounds = array<i64: 2, 32>}, {pipeline_mode = #tpu.pipeline_mode<synchronous>, transform_indices = @transform_1, window_bounds = array<i64: 1, 32>}, {pipeline_mode = #tpu.pipeline_mode<synchronous>, transform_indices = @transform_2, window_bounds = array<i64: 1, 32>}, {pipeline_mode = #tpu.pipeline_mode<synchronous>, transform_indices = @transform_3, window_bounds = array<i64: 32, 10>}, {pipeline_mode = #tpu.pipeline_mode<synchronous>, transform_indices = @transform_4, window_bounds = array<i64: 1, 10>}, {pipeline_mode = #tpu.pipeline_mode<synchronous>, transform_indices = @transform_5, window_bounds = array<i64: 2, 10>}]} {
    %c0 = arith.constant 0 : index
    %c0_0 = arith.constant 0 : index
    %0 = vector.load %arg1[%c0, %c0_0] : memref<2x32xbf16, #tpu.memory_space<vmem>>, vector<2x32xbf16>
    %1 = arith.extf %0 : vector<2x32xbf16> to vector<2x32xf32>
    %c0_1 = arith.constant 0 : index
    %c0_2 = arith.constant 0 : index
    %2 = vector.load %arg2[%c0_1, %c0_2] : memref<1x32xf32, #tpu.memory_space<vmem>>, vector<1x32xf32>
    %c0_3 = arith.constant 0 : index
    %c0_4 = arith.constant 0 : index
    %3 = vector.load %arg3[%c0_3, %c0_4] : memref<1x32xf32, #tpu.memory_space<vmem>>, vector<1x32xf32>
    %cst = arith.constant dense<0.000000e+00> : vector<2xf32>
    %4 = vector.multi_reduction <add>, %1, %cst [1] : vector<2x32xf32> to vector<2xf32>
    %5 = vector.shape_cast %4 : vector<2xf32> to vector<2x1xf32>
    %cst_5 = arith.constant 3.200000e+01 : f32
    %6 = vector.broadcast %cst_5 : f32 to vector<2x1xf32>
    %7 = arith.divf %5, %6 : vector<2x1xf32>
    %8 = vector.broadcast %7 : vector<2x1xf32> to vector<2x32xf32>
    %9 = arith.subf %1, %8 : vector<2x32xf32>
    %10 = arith.mulf %9, %9 : vector<2x32xf32>
    %cst_6 = arith.constant dense<0.000000e+00> : vector<2xf32>
    %11 = vector.multi_reduction <add>, %10, %cst_6 [1] : vector<2x32xf32> to vector<2xf32>
    %12 = vector.shape_cast %11 : vector<2xf32> to vector<2x1xf32>
    %cst_7 = arith.constant 3.200000e+01 : f32
    %13 = vector.broadcast %cst_7 : f32 to vector<2x1xf32>
    %14 = arith.divf %12, %13 : vector<2x1xf32>
    %15 = vector.broadcast %7 : vector<2x1xf32> to vector<2x32xf32>
    %16 = arith.subf %1, %15 : vector<2x32xf32>
    %cst_8 = arith.constant 9.99999974E-6 : f32
    %17 = vector.broadcast %cst_8 : f32 to vector<2x1xf32>
    %18 = arith.addf %14, %17 : vector<2x1xf32>
    %19 = math.rsqrt %18 : vector<2x1xf32>
    %20 = vector.broadcast %19 : vector<2x1xf32> to vector<2x32xf32>
    %21 = arith.mulf %16, %20 : vector<2x32xf32>
    %22 = vector.broadcast %2 : vector<1x32xf32> to vector<2x32xf32>
    %23 = arith.mulf %21, %22 : vector<2x32xf32>
    %24 = vector.broadcast %3 : vector<1x32xf32> to vector<2x32xf32>
    %25 = arith.addf %23, %24 : vector<2x32xf32>
    %c0_9 = arith.constant 0 : index
    %c0_10 = arith.constant 0 : index
    %26 = vector.load %arg4[%c0_9, %c0_10] : memref<32x10xf32, #tpu.memory_space<vmem>>, vector<32x10xf32>
    %cst_11 = arith.constant dense<0.000000e+00> : vector<2x10xf32>
    %27 = tpu.matmul %25, %26, %cst_11 {dimension_numbers = #tpu.dot_dimension_numbers<[1], [0], [0], [1], [0, 0, 1, 1], [], []>} : vector<2x32xf32>, vector<32x10xf32>, vector<2x10xf32> -> vector<2x10xf32>
    %c0_12 = arith.constant 0 : index
    %c0_13 = arith.constant 0 : index
    %28 = vector.load %arg5[%c0_12, %c0_13] : memref<1x10xf32, #tpu.memory_space<vmem>>, vector<1x10xf32>
    %29 = vector.broadcast %28 : vector<1x10xf32> to vector<2x10xf32>
    %30 = arith.addf %27, %29 : vector<2x10xf32>
    %c0_14 = arith.constant 0 : index
    %c0_15 = arith.constant 0 : index
    %31 = vector.load %arg6[%c0_14, %c0_15] : memref<2x10xf32, #tpu.memory_space<vmem>>, vector<2x10xf32>
    tpu.vector_store %arg6[%c0_14, %c0_15], %30 {strides = array<i32>} : memref<2x10xf32, #tpu.memory_space<vmem>>, vector<2x10xf32>,
    return
  }
  func.func @transform_0(%arg0: i32) -> (i32, i32) {
    %c0_i32 = arith.constant 0 : i32
    %c0_i32_0 = arith.constant 0 : i32
    %c0_i32_1 = arith.constant 0 : i32
    return %c0_i32, %c0_i32_0 : i32, i32
  }
  func.func @transform_1(%arg0: i32) -> (i32, i32) {
    %c0_i32 = arith.constant 0 : i32
    %c0_i32_0 = arith.constant 0 : i32
    %c0_i32_1 = arith.constant 0 : i32
    return %c0_i32, %c0_i32_0 : i32, i32
  }
  func.func @transform_2(%arg0: i32) -> (i32, i32) {
    %c0_i32 = arith.constant 0 : i32
    %c0_i32_0 = arith.constant 0 : i32
    %c0_i32_1 = arith.constant 0 : i32
    return %c0_i32, %c0_i32_0 : i32, i32
  }
  func.func @transform_3(%arg0: i32) -> (i32, i32) {
    %c0_i32 = arith.constant 0 : i32
    %c0_i32_0 = arith.constant 0 : i32
    %c0_i32_1 = arith.constant 0 : i32
    return %c0_i32, %c0_i32_0 : i32, i32
  }
  func.func @transform_4(%arg0: i32) -> (i32, i32) {
    %c0_i32 = arith.constant 0 : i32
    %c0_i32_0 = arith.constant 0 : i32
    %c0_i32_1 = arith.constant 0 : i32
    return %c0_i32, %c0_i32_0 : i32, i32
  }
  func.func @transform_5(%arg0: i32) -> (i32, i32) {
    %c0_i32 = arith.constant 0 : i32
    %c0_i32_0 = arith.constant 0 : i32
    %c0_i32_1 = arith.constant 0 : i32
    return %c0_i32, %c0_i32_0 : i32, i32
  }
}

module attributes {stable_mosaic.version = 11 : i64} {
  func.func @_block_kernel(%arg0: i32, %arg1: memref<1x24x32xbf16, #tpu.memory_space<vmem>>, %arg2: memref<1x32xf32, #tpu.memory_space<vmem>>, %arg3: memref<1x32xf32, #tpu.memory_space<vmem>>, %arg4: memref<2x24x24xbf16, #tpu.memory_space<vmem>>, %arg5: memref<1x32xf32, #tpu.memory_space<vmem>>, %arg6: memref<1x32xf32, #tpu.memory_space<vmem>>, %arg7: memref<32x128xbf16, #tpu.memory_space<vmem>>, %arg8: memref<1x128xf32, #tpu.memory_space<vmem>>, %arg9: memref<128x32xbf16, #tpu.memory_space<vmem>>, %arg10: memref<1x32xf32, #tpu.memory_space<vmem>>, %arg11: memref<1x24x32xbf16, #tpu.memory_space<vmem>>) attributes {dimension_semantics = [#tpu.dimension_semantics<parallel>], iteration_bounds = array<i64: 2>, scalar_prefetch = 0 : i64, scratch_operands = 0 : i64, tpu.core_type = #tpu.core_type<tc>, window_params = [{transform_indices = @transform_0, window_bounds = array<i64: 1, 24, 32>}, {pipeline_mode = #tpu.pipeline_mode<synchronous>, transform_indices = @transform_1, window_bounds = array<i64: 1, 32>}, {pipeline_mode = #tpu.pipeline_mode<synchronous>, transform_indices = @transform_2, window_bounds = array<i64: 1, 32>}, {pipeline_mode = #tpu.pipeline_mode<synchronous>, transform_indices = @transform_3, window_bounds = array<i64: 2, 24, 24>}, {pipeline_mode = #tpu.pipeline_mode<synchronous>, transform_indices = @transform_4, window_bounds = array<i64: 1, 32>}, {pipeline_mode = #tpu.pipeline_mode<synchronous>, transform_indices = @transform_5, window_bounds = array<i64: 1, 32>}, {pipeline_mode = #tpu.pipeline_mode<synchronous>, transform_indices = @transform_6, window_bounds = array<i64: 32, 128>}, {pipeline_mode = #tpu.pipeline_mode<synchronous>, transform_indices = @transform_7, window_bounds = array<i64: 1, 128>}, {pipeline_mode = #tpu.pipeline_mode<synchronous>, transform_indices = @transform_8, window_bounds = array<i64: 128, 32>}, {pipeline_mode = #tpu.pipeline_mode<synchronous>, transform_indices = @transform_9, window_bounds = array<i64: 1, 32>}, {transform_indices = @transform_10, window_bounds = array<i64: 1, 24, 32>}]} {
    %c0 = arith.constant 0 : index
    %c0_0 = arith.constant 0 : index
    %c0_1 = arith.constant 0 : index
    %0 = vector.load %arg1[%c0, %c0_0, %c0_1] : memref<1x24x32xbf16, #tpu.memory_space<vmem>>, vector<1x24x32xbf16>
    %1 = vector.shape_cast %0 : vector<1x24x32xbf16> to vector<24x32xbf16>
    %2 = arith.extf %1 : vector<24x32xbf16> to vector<24x32xf32>
    %c0_2 = arith.constant 0 : index
    %c0_3 = arith.constant 0 : index
    %3 = vector.load %arg2[%c0_2, %c0_3] : memref<1x32xf32, #tpu.memory_space<vmem>>, vector<1x32xf32>
    %c0_4 = arith.constant 0 : index
    %c0_5 = arith.constant 0 : index
    %4 = vector.load %arg3[%c0_4, %c0_5] : memref<1x32xf32, #tpu.memory_space<vmem>>, vector<1x32xf32>
    %cst = arith.constant dense<0.000000e+00> : vector<24xf32>
    %5 = vector.multi_reduction <add>, %2, %cst [1] : vector<24x32xf32> to vector<24xf32>
    %6 = vector.shape_cast %5 : vector<24xf32> to vector<24x1xf32>
    %cst_6 = arith.constant 3.200000e+01 : f32
    %7 = vector.broadcast %cst_6 : f32 to vector<24x1xf32>
    %8 = arith.divf %6, %7 : vector<24x1xf32>
    %9 = vector.broadcast %8 : vector<24x1xf32> to vector<24x32xf32>
    %10 = arith.subf %2, %9 : vector<24x32xf32>
    %11 = arith.mulf %10, %10 : vector<24x32xf32>
    %cst_7 = arith.constant dense<0.000000e+00> : vector<24xf32>
    %12 = vector.multi_reduction <add>, %11, %cst_7 [1] : vector<24x32xf32> to vector<24xf32>
    %13 = vector.shape_cast %12 : vector<24xf32> to vector<24x1xf32>
    %cst_8 = arith.constant 3.200000e+01 : f32
    %14 = vector.broadcast %cst_8 : f32 to vector<24x1xf32>
    %15 = arith.divf %13, %14 : vector<24x1xf32>
    %16 = vector.broadcast %8 : vector<24x1xf32> to vector<24x32xf32>
    %17 = arith.subf %2, %16 : vector<24x32xf32>
    %cst_9 = arith.constant 9.99999974E-6 : f32
    %18 = vector.broadcast %cst_9 : f32 to vector<24x1xf32>
    %19 = arith.addf %15, %18 : vector<24x1xf32>
    %20 = math.rsqrt %19 : vector<24x1xf32>
    %21 = vector.broadcast %20 : vector<24x1xf32> to vector<24x32xf32>
    %22 = arith.mulf %17, %21 : vector<24x32xf32>
    %23 = vector.broadcast %3 : vector<1x32xf32> to vector<24x32xf32>
    %24 = arith.mulf %22, %23 : vector<24x32xf32>
    %25 = vector.broadcast %4 : vector<1x32xf32> to vector<24x32xf32>
    %26 = arith.addf %24, %25 : vector<24x32xf32>
    %27 = arith.truncf %26 : vector<24x32xf32> to vector<24x32xbf16>
    %c0_10 = arith.constant 0 : index
    %c0_11 = arith.constant 0 : index
    %c0_12 = arith.constant 0 : index
    %28 = vector.load %arg4[%c0_10, %c0_11, %c0_12] : memref<2x24x24xbf16, #tpu.memory_space<vmem>>, vector<1x24x24xbf16>
    %29 = vector.shape_cast %28 : vector<1x24x24xbf16> to vector<24x24xbf16>
    %30 = vector.extract_strided_slice %27 {offsets = [0, 0], sizes = [24, 16], strides = [1, 1]} : vector<24x32xbf16> to vector<24x16xbf16>
    %cst_13 = arith.constant dense<0.000000e+00> : vector<24x16xf32>
    %31 = tpu.matmul %29, %30, %cst_13 {dimension_numbers = #tpu.dot_dimension_numbers<[1], [0], [0], [1], [0, 0, 1, 1], [], []>} : vector<24x24xbf16>, vector<24x16xbf16>, vector<24x16xf32> -> vector<24x16xf32>
    %c1 = arith.constant 1 : index
    %c0_14 = arith.constant 0 : index
    %c0_15 = arith.constant 0 : index
    %32 = vector.load %arg4[%c1, %c0_14, %c0_15] : memref<2x24x24xbf16, #tpu.memory_space<vmem>>, vector<1x24x24xbf16>
    %33 = vector.shape_cast %32 : vector<1x24x24xbf16> to vector<24x24xbf16>
    %34 = vector.extract_strided_slice %27 {offsets = [0, 16], sizes = [24, 16], strides = [1, 1]} : vector<24x32xbf16> to vector<24x16xbf16>
    %cst_16 = arith.constant dense<0.000000e+00> : vector<24x16xf32>
    %35 = tpu.matmul %33, %34, %cst_16 {dimension_numbers = #tpu.dot_dimension_numbers<[1], [0], [0], [1], [0, 0, 1, 1], [], []>} : vector<24x24xbf16>, vector<24x16xbf16>, vector<24x16xf32> -> vector<24x16xf32>
    %36 = tpu.concatenate %31, %35 in 1 : vector<24x16xf32>, vector<24x16xf32> -> vector<24x32xf32>
    %37 = arith.addf %2, %36 : vector<24x32xf32>
    %c0_17 = arith.constant 0 : index
    %c0_18 = arith.constant 0 : index
    %38 = vector.load %arg5[%c0_17, %c0_18] : memref<1x32xf32, #tpu.memory_space<vmem>>, vector<1x32xf32>
    %c0_19 = arith.constant 0 : index
    %c0_20 = arith.constant 0 : index
    %39 = vector.load %arg6[%c0_19, %c0_20] : memref<1x32xf32, #tpu.memory_space<vmem>>, vector<1x32xf32>
    %cst_21 = arith.constant dense<0.000000e+00> : vector<24xf32>
    %40 = vector.multi_reduction <add>, %37, %cst_21 [1] : vector<24x32xf32> to vector<24xf32>
    %41 = vector.shape_cast %40 : vector<24xf32> to vector<24x1xf32>
    %cst_22 = arith.constant 3.200000e+01 : f32
    %42 = vector.broadcast %cst_22 : f32 to vector<24x1xf32>
    %43 = arith.divf %41, %42 : vector<24x1xf32>
    %44 = vector.broadcast %43 : vector<24x1xf32> to vector<24x32xf32>
    %45 = arith.subf %37, %44 : vector<24x32xf32>
    %46 = arith.mulf %45, %45 : vector<24x32xf32>
    %cst_23 = arith.constant dense<0.000000e+00> : vector<24xf32>
    %47 = vector.multi_reduction <add>, %46, %cst_23 [1] : vector<24x32xf32> to vector<24xf32>
    %48 = vector.shape_cast %47 : vector<24xf32> to vector<24x1xf32>
    %cst_24 = arith.constant 3.200000e+01 : f32
    %49 = vector.broadcast %cst_24 : f32 to vector<24x1xf32>
    %50 = arith.divf %48, %49 : vector<24x1xf32>
    %51 = vector.broadcast %43 : vector<24x1xf32> to vector<24x32xf32>
    %52 = arith.subf %37, %51 : vector<24x32xf32>
    %cst_25 = arith.constant 9.99999974E-6 : f32
    %53 = vector.broadcast %cst_25 : f32 to vector<24x1xf32>
    %54 = arith.addf %50, %53 : vector<24x1xf32>
    %55 = math.rsqrt %54 : vector<24x1xf32>
    %56 = vector.broadcast %55 : vector<24x1xf32> to vector<24x32xf32>
    %57 = arith.mulf %52, %56 : vector<24x32xf32>
    %58 = vector.broadcast %38 : vector<1x32xf32> to vector<24x32xf32>
    %59 = arith.mulf %57, %58 : vector<24x32xf32>
    %60 = vector.broadcast %39 : vector<1x32xf32> to vector<24x32xf32>
    %61 = arith.addf %59, %60 : vector<24x32xf32>
    %62 = arith.truncf %61 : vector<24x32xf32> to vector<24x32xbf16>
    %cst_26 = arith.constant 0.000000e+00 : f32
    %63 = vector.broadcast %cst_26 : f32 to vector<24x32xf32>
    %c0_27 = arith.constant 0 : index
    %c0_28 = arith.constant 0 : index
    %64 = vector.load %arg7[%c0_27, %c0_28] : memref<32x128xbf16, #tpu.memory_space<vmem>>, vector<32x128xbf16>
    %cst_29 = arith.constant dense<0.000000e+00> : vector<24x128xf32>
    %65 = tpu.matmul %62, %64, %cst_29 {dimension_numbers = #tpu.dot_dimension_numbers<[1], [0], [0], [1], [0, 0, 1, 1], [], []>} : vector<24x32xbf16>, vector<32x128xbf16>, vector<24x128xf32> -> vector<24x128xf32>
    %c0_30 = arith.constant 0 : index
    %c0_31 = arith.constant 0 : index
    %66 = vector.load %arg8[%c0_30, %c0_31] : memref<1x128xf32, #tpu.memory_space<vmem>>, vector<1x128xf32>
    %67 = vector.broadcast %66 : vector<1x128xf32> to vector<24x128xf32>
    %68 = arith.addf %65, %67 : vector<24x128xf32>
    %69 = arith.mulf %68, %68 : vector<24x128xf32>
    %70 = arith.mulf %68, %69 : vector<24x128xf32>
    %cst_32 = arith.constant 4.471500e-02 : f32
    %71 = vector.broadcast %cst_32 : f32 to vector<24x128xf32>
    %72 = arith.mulf %71, %70 : vector<24x128xf32>
    %73 = arith.addf %68, %72 : vector<24x128xf32>
    %cst_33 = arith.constant 0.797884583 : f32
    %74 = vector.broadcast %cst_33 : f32 to vector<24x128xf32>
    %75 = arith.mulf %74, %73 : vector<24x128xf32>
    %76 = math.tanh %75 : vector<24x128xf32>
    %cst_34 = arith.constant 1.000000e+00 : f32
    %77 = vector.broadcast %cst_34 : f32 to vector<24x128xf32>
    %78 = arith.addf %77, %76 : vector<24x128xf32>
    %cst_35 = arith.constant 5.000000e-01 : f32
    %79 = vector.broadcast %cst_35 : f32 to vector<24x128xf32>
    %80 = arith.mulf %79, %78 : vector<24x128xf32>
    %81 = arith.mulf %68, %80 : vector<24x128xf32>
    %82 = arith.truncf %81 : vector<24x128xf32> to vector<24x128xbf16>
    %c0_36 = arith.constant 0 : index
    %c0_37 = arith.constant 0 : index
    %83 = vector.load %arg9[%c0_36, %c0_37] : memref<128x32xbf16, #tpu.memory_space<vmem>>, vector<128x32xbf16>
    %cst_38 = arith.constant dense<0.000000e+00> : vector<24x32xf32>
    %84 = tpu.matmul %82, %83, %cst_38 {dimension_numbers = #tpu.dot_dimension_numbers<[1], [0], [0], [1], [0, 0, 1, 1], [], []>} : vector<24x128xbf16>, vector<128x32xbf16>, vector<24x32xf32> -> vector<24x32xf32>
    %85 = arith.addf %63, %84 : vector<24x32xf32>
    %86 = arith.addf %37, %85 : vector<24x32xf32>
    %c0_39 = arith.constant 0 : index
    %c0_40 = arith.constant 0 : index
    %87 = vector.load %arg10[%c0_39, %c0_40] : memref<1x32xf32, #tpu.memory_space<vmem>>, vector<1x32xf32>
    %88 = vector.broadcast %87 : vector<1x32xf32> to vector<24x32xf32>
    %89 = arith.addf %86, %88 : vector<24x32xf32>
    %90 = arith.truncf %89 : vector<24x32xf32> to vector<24x32xbf16>
    %c0_41 = arith.constant 0 : index
    %c0_42 = arith.constant 0 : index
    %c0_43 = arith.constant 0 : index
    %91 = vector.load %arg11[%c0_41, %c0_42, %c0_43] : memref<1x24x32xbf16, #tpu.memory_space<vmem>>, vector<1x24x32xbf16>
    %92 = vector.shape_cast %91 : vector<1x24x32xbf16> to vector<24x32xbf16>
    %93 = vector.shape_cast %90 : vector<24x32xbf16> to vector<1x24x32xbf16>
    tpu.vector_store %arg11[%c0_41, %c0_42, %c0_43], %93 {strides = array<i32>} : memref<1x24x32xbf16, #tpu.memory_space<vmem>>, vector<1x24x32xbf16>,
    return
  }
  func.func @transform_0(%arg0: i32) -> (i32, i32, i32) {
    %c0_i32 = arith.constant 0 : i32
    %c0_i32_0 = arith.constant 0 : i32
    %c0_i32_1 = arith.constant 0 : i32
    return %arg0, %c0_i32, %c0_i32_0 : i32, i32, i32
  }
  func.func @transform_1(%arg0: i32) -> (i32, i32) {
    %c0_i32 = arith.constant 0 : i32
    %c0_i32_0 = arith.constant 0 : i32
    %c0_i32_1 = arith.constant 0 : i32
    return %c0_i32, %c0_i32_0 : i32, i32
  }
  func.func @transform_2(%arg0: i32) -> (i32, i32) {
    %c0_i32 = arith.constant 0 : i32
    %c0_i32_0 = arith.constant 0 : i32
    %c0_i32_1 = arith.constant 0 : i32
    return %c0_i32, %c0_i32_0 : i32, i32
  }
  func.func @transform_3(%arg0: i32) -> (i32, i32, i32) {
    %c0_i32 = arith.constant 0 : i32
    %c0_i32_0 = arith.constant 0 : i32
    %c0_i32_1 = arith.constant 0 : i32
    %c0_i32_2 = arith.constant 0 : i32
    return %c0_i32, %c0_i32_0, %c0_i32_1 : i32, i32, i32
  }
  func.func @transform_4(%arg0: i32) -> (i32, i32) {
    %c0_i32 = arith.constant 0 : i32
    %c0_i32_0 = arith.constant 0 : i32
    %c0_i32_1 = arith.constant 0 : i32
    return %c0_i32, %c0_i32_0 : i32, i32
  }
  func.func @transform_5(%arg0: i32) -> (i32, i32) {
    %c0_i32 = arith.constant 0 : i32
    %c0_i32_0 = arith.constant 0 : i32
    %c0_i32_1 = arith.constant 0 : i32
    return %c0_i32, %c0_i32_0 : i32, i32
  }
  func.func @transform_6(%arg0: i32) -> (i32, i32) {
    %c0_i32 = arith.constant 0 : i32
    %c0_i32_0 = arith.constant 0 : i32
    %c0_i32_1 = arith.constant 0 : i32
    return %c0_i32, %c0_i32_0 : i32, i32
  }
  func.func @transform_7(%arg0: i32) -> (i32, i32) {
    %c0_i32 = arith.constant 0 : i32
    %c0_i32_0 = arith.constant 0 : i32
    %c0_i32_1 = arith.constant 0 : i32
    return %c0_i32, %c0_i32_0 : i32, i32
  }
  func.func @transform_8(%arg0: i32) -> (i32, i32) {
    %c0_i32 = arith.constant 0 : i32
    %c0_i32_0 = arith.constant 0 : i32
    %c0_i32_1 = arith.constant 0 : i32
    return %c0_i32, %c0_i32_0 : i32, i32
  }
  func.func @transform_9(%arg0: i32) -> (i32, i32) {
    %c0_i32 = arith.constant 0 : i32
    %c0_i32_0 = arith.constant 0 : i32
    %c0_i32_1 = arith.constant 0 : i32
    return %c0_i32, %c0_i32_0 : i32, i32
  }
  func.func @transform_10(%arg0: i32) -> (i32, i32, i32) {
    %c0_i32 = arith.constant 0 : i32
    %c0_i32_0 = arith.constant 0 : i32
    %c0_i32_1 = arith.constant 0 : i32
    return %arg0, %c0_i32, %c0_i32_0 : i32, i32, i32
  }
}

</mosaic_0001>

<bundles_post_ra>
// kernel: spectre_vit_forward.4
= control target key start
LH: loop header
LB: loop body
LE: loop exit
PB: predicated region body
PF: predicated region fallthrough
CT: control target
= control target key end

     0   :  { %vm50_vm0 = vcmask 392192   ;;  %vm76_vm1 = vcmask 261120   ;;  %s157_s1 = inlined_call_operand.vmem [shape: bf16[48,32], index: 1, kind: input, shape index: {}]   ;;  %s158_s0 = inlined_call_operand.vmem [shape: bf16[32,48], index: 0, kind: input, shape index: {}]   ;;  %s159_s2 = inlined_call_operand.vmem [shape: f32[32,32], index: 2, kind: output, shape index: {}]  }
   0x1   :  { %v111_v0 = vld [vmem:[%s157_s1 + $0x10] sm:$0xff]  ;;  %v110_v1 = vld [vmem:[%s157_s1 + $0x8] sm:$0xff]  ;;  %v109_v2 = vld [vmem:[%s157_s1] sm:$0xff] }
   0x2   :  { %62 = vmatpush.bf16.msra.mxu0 %v111_v0  ;;  %112 = vmatpush.bf16.msra.mxu1 %v111_v0  ;;  %v107_v3 = vld [vmem:[%s158_s0] sm:$0xff]  ;;  %v108_v4 = vld [vmem:[%s158_s0 + $0x8] sm:$0xff] }
   0x6   :  { %63 = vmatpush.bf16.msra.mxu0 %v110_v1  ;;  %113 = vmatpush.bf16.msra.mxu1 %v110_v1 }
   0xa   :  { %64 = vmatpush.bf16.msra.mxu0 %v109_v2  ;;  %114 = vmatpush.bf16.msra.mxu1 %v109_v2 }
   0xd   :  { %105 = vmatmul.msk.bf16.vlgmr.msra.gmra.mxu0 %vm50_vm0, %v107_v3  ;;  %106 = vmatmul.msk.bf16.vlgmr.msra.gmra.mxu1 %vm50_vm0, %v108_v4 }
  0x8a   :  { %v66_v5 = vpop.f32.mrf.mxu0  ;;  %v71_v6 = vpop.f32.mrf.mxu1 }
  0x8b   :  { %77 = vst.msk [vmem:[%s159_s2] sm:$0xff] %vm76_vm1, %v66_v5 }
  0x8c   :  { %79 = vst.msk [vmem:[%s159_s2 + $0x10] sm:$0xff] %vm76_vm1, %v71_v6 }
  0x92   :  { %v68_v7 = vpop.f32.mrf.mxu0  ;;  %v73_v8 = vpop.f32.mrf.mxu1 }
  0x93   :  { %78 = vst.msk [vmem:[%s159_s2 + $0x8] sm:$0xff] %vm76_vm1, %v68_v7 }
  0x94   :  { %80 = vst.msk [vmem:[%s159_s2 + $0x18] sm:$0xff] %vm76_vm1, %v73_v8 }

// kernel: spectre_vit_forward.7
= control target key start
LH: loop header
LB: loop body
LE: loop exit
PB: predicated region body
PF: predicated region fallthrough
CT: control target
= control target key end

     0   :  { %vm25_vm0 = vcmask 254976   ;;  %s210_s0 = inlined_call_operand.vmem [shape: bf16[2,32], index: 0, kind: input, shape index: {}]   ;;  %s211_s1 = inlined_call_operand.vmem [shape: f32[1,32], index: 1, kind: input, shape index: {}]   ;;  %s212_s2 = inlined_call_operand.vmem [shape: f32[1,32], index: 2, kind: input, shape index: {}]   ;;  %s213_s3 = inlined_call_operand.vmem [shape: f32[32,10], index: 3, kind: input, shape index: {}]   ;;  %s214_s4 = inlined_call_operand.vmem [shape: f32[1,10], index: 4, kind: input, shape index: {}]   ;;  %s215_s5 = inlined_call_operand.hbm [shape: f32[2,10], index: 5, kind: output, shape index: {}]  }
   0x1   :  { %v21_v0 = vld [vmem:[%s210_s0] sm:$0x1] }
   0x2   :  { %v22_v1 = vunpack.c.l.bf16 %v21_v0 }
   0x3   :  { %10 = vsyncpa [#allocation3], 0  ;;  %v149_v3 = vmov 32.0   ;;  %v66_v15 = vld [vmem:[%s213_s3 + $0x18] sm:$0xff]  ;;  %v65_v16 = vld [vmem:[%s213_s3 + $0x10] sm:$0xff]  ;;  %vm71_vm5 = vcmask 261120  }
   0x4   :  { %v26_v2 = vsel %vm25_vm0, %v22_v1, 0.0  ;;  %119 = vrcp.f32 %v149_v3  ;;  %87 = vmatpush.msra.mxu0 %v66_v15  ;;  %v64_v17 = vld [vmem:[%s213_s3 + $0x8] sm:$0xff]  ;;  %v63_v18 = vld [vmem:[%s213_s3] sm:$0xff]  ;;  %s150_s7 = smov [#allocation2]   ;;  %vm95_vm6 = vcmask 74752  }
   0x5   :  { %27 = vadd.xlane.f32.xlu0 %v26_v2  ;;  %v116_v28 = vld [vmem:[%s211_s1] ss:$0 sm:$0xff]  ;;  %s102_s8 = sshll.u32 %s150_s7, 4  ;;  %s104_s1 = sshll.u32 %s215_s5, 4  ;;  %s103_s8 = int_to_ptr.vmem [resolvable:$true] %s102_s8  ;;  %s105_s1 = int_to_ptr.hbm [resolvable:$true] %s104_s1 }
   0x6   :  { %88 = vmatpush.msra.mxu0 %v65_v16  ;;  %v117_v31 = vld [vmem:[%s212_s2] ss:$0 sm:$0xff] }
   0x7   :  { %v118_v34 = vld [vmem:[%s214_s4] ss:$0 sm:$0xff] }
   0x8   :  { %89 = vmatpush.msra.mxu0 %v64_v17 }
   0xa   :  { %v120_v4 = vpop.eup %119  ;;  %90 = vmatpush.msra.mxu0 %v63_v18 }
   0xb   :  { %v30_v5 = vmul.f32 32.0, %v120_v4  ;;  %vm34_vm1 = vweird.f32 %v120_v4 }
   0xd   :  { %v31_v6 = vsub.f32 1.0, %v30_v5 }
   0xf   :  { %v32_v7 = vmul.f32 %v120_v4, %v31_v6 }
  0x11   :  { %v33_v8 = vadd.f32 %v120_v4, %v32_v7 }
  0x13   :  { %v35_v9 = vsel %vm34_vm1, %v120_v4, %v33_v8 }
  0x78   :  { %v28_v10 = vpop.xlane.xlu0 %27 }
  0x79   :  { %v36_v11 = vmul.f32 %v35_v9, %v28_v10 }
  0x7b   :  { %v37_v12 = vsub.f32 %v22_v1, %v36_v11 }
  0x7d   :  { %v38_v13 = vmul.f32 %v37_v12, %v37_v12 }
  0x7f   :  { %v39_v14 = vsel %vm25_vm0, %v38_v13, 0.0 }
  0x80   :  { %40 = vadd.xlane.f32.xlu0 %v39_v14 }
  0xf3   :  { %v41_v19 = vpop.xlane.xlu0 %40 }
  0xf4   :  { %v42_v20 = vmul.f32 %v41_v19, %v35_v9 }
  0xf6   :  { %v43_v21 = vadd.f32 1e-05, %v42_v20 }
  0xf8   :  { %121 = vrsqrt.f32 %v43_v21  ;;  %vm50_vm3 = vweird.f32 %v43_v21 }
  0xfe   :  { %v122_v22 = vpop.eup %121 }
  0xff   :  { %v45_v23 = vmul.f32 %v122_v22, %v43_v21  ;;  %vm51_vm2 = vweird.f32 %v122_v22 }
 0x100   :  { %vm52_vm4 = vmor %vm50_vm3, %vm51_vm2 }
 0x101   :  { %v46_v24 = vmul.f32 %v122_v22, %v45_v23 }
 0x103   :  { %v47_v25 = vmul.f32 0.5, %v46_v24 }
 0x105   :  { %v48_v26 = vsub.f32 1.5, %v47_v25 }
 0x107   :  { %v49_v27 = vmul.f32 %v122_v22, %v48_v26 }
 0x109   :  { %v53_v29 = vsel %vm52_vm4, %v122_v22, %v49_v27 }
 0x10a   :  { %v54_v30 = vmul.f32 %v53_v29, %v37_v12 }
 0x10c   :  { %v58_v32 = vmul.f32 %v116_v28, %v54_v30 }
 0x10e   :  { %v62_v33 = vadd.f32 %v117_v31, %v58_v32 }
 0x110   :  { %113 = vmatmul.msk.f32.vlgmr.msra.gmra.mxu0 %vm71_vm5, %v62_v33 }
 0x18d   :  { %v92_v35 = vpop.f32.mrf.mxu0 }
 0x18e   :  { %v93_v36 = vadd.f32 %v118_v34, %v92_v35 }
 0x190   :  { %96 = vst.msk [vmem:[#allocation2] sm:$0x3] %vm95_vm6, %v93_v36 }
 0x191   :  { %107 = dma.vmem_to_hbm [thread:$0]  %s103_s8, 32, %s105_s1, [#allocation3]  }
 0x192   :  { %147 = dma.done.wait [#allocation3], 32  }
 0x193   :  { %148 = vsyncadd [#allocation3], 4294967264 }
 0x194   :  { %112 = vsyncpa [#allocation3], 1 }

// kernel: spectre_vit_forward.5
= control target key start
LH: loop header
LB: loop body
LE: loop exit
PB: predicated region body
PF: predicated region fallthrough
CT: control target
= control target key end

     0   :  { %s1073_s13 = smov 0   ;;  %s1227_s0 = inlined_call_operand.vmem [shape: bf16[2,24,32], index: 0, kind: input, shape index: {}]   ;;  %s1228_s1 = inlined_call_operand.vmem [shape: f32[1,32], index: 1, kind: input, shape index: {}]   ;;  %s1229_s2 = inlined_call_operand.vmem [shape: f32[1,32], index: 2, kind: input, shape index: {}]   ;;  %s1230_s3 = inlined_call_operand.vmem [shape: bf16[2,24,24], index: 3, kind: input, shape index: {}]   ;;  %s1231_s4 = inlined_call_operand.vmem [shape: f32[1,32], index: 4, kind: input, shape index: {}]   ;;  %s1232_s5 = inlined_call_operand.vmem [shape: f32[1,32], index: 5, kind: input, shape index: {}]   ;;  %s1233_s6 = inlined_call_operand.vmem [shape: bf16[32,128], index: 6, kind: input, shape index: {}]   ;;  %s1234_s7 = inlined_call_operand.vmem [shape: f32[1,128], index: 7, kind: input, shape index: {}]   ;;  %s1235_s8 = inlined_call_operand.vmem [shape: bf16[128,32], index: 8, kind: input, shape index: {}]   ;;  %s1236_s9 = inlined_call_operand.vmem [shape: f32[1,32], index: 9, kind: input, shape index: {}]   ;;  %s1237_s10 = inlined_call_operand.vmem [shape: bf16[2,24,32], index: 10, kind: output, shape index: {}]  }
   0x1 LB: > { %s879_s14 = sadd.s32 4294967295, %s1013_s13   ;;  %p883_p0 = scmp.ge.s32.totalorder %s1013_s13, 1  ;;  %s1013_s13 = sphi %s1073_s13, %s20_s13  }
   0x2   : > { %p312_p1 = scmp.lt.s32.totalorder %s1013_s13, 3 }
   0x4   : > { %p313_p2 = pnand %p883_p0, %p312_p1 }
   0x5   : > { %p350_p3 = scmp.lt.s32.totalorder (!%p313_p2), %s879_s14, 1  ;;  %s1016_s23 = smov (!%p313_p2), 112  }
   0x6   : > { %316 = sbr.rel (%p313_p2) target bundleno = 1263 (0x4ef), region = 60  ;;  %s1017_s12 = smov (!%p313_p2), 16  }
   0xb   : > { %s1239_s14 = smov (!%p350_p3, %s879_s14), 1  ;;  %vm369_vm0 = vcmask 261120   ;;  %v1015_v8 = vmov 32.0   ;;  %v981_v47 = vld [vmem:[%s1228_s1] ss:$0 sm:$0xff]  ;;  %vm485_vm8 = vcmask 1043456  }
   0xc   : > { %s969_s15 = smul.u32 12, %s1239_s14  ;;  %987 = vrcp.f32 %v1015_v8  ;;  %v982_v51 = vld [vmem:[%s1229_s2] ss:$0 sm:$0xff]  ;;  %vm478_vm12 = vcmask 195584   ;;  %vm563_vm13 = vcmask 130048  }
   0xe   : > { %s354_s18 = scalar_lea.vmem %s1227_s0, %s969_s15  ;;  %s359_s29 = scalar_lea.vmem %s1237_s10, %s969_s15 }
   0xf   : > { %v363_v0 = vld [vmem:[%s354_s18 + $0x8] sm:$0xf]  ;;  %v958_v1 = vld [vmem:[%s354_s18] sm:$0xff]  }
  0x10   : > { %v1089_v2 = vunpack.c.l.bf16 %v363_v0  ;;  %v1091_v3 = vunpack.c.h.bf16 %v958_v1  ;;  %v1097_v6 = vunpack.c.l.bf16 %v958_v1 }
  0x12   : > { %v376_v4 = vsel %vm369_vm0, %v1089_v2, 0.0  ;;  %v373_v5 = vsel %vm369_vm0, %v1091_v3, 0.0  ;;  %v370_v7 = vsel %vm369_vm0, %v1097_v6, 0.0  ;;  %v988_v9 = vpop.eup %987 }
  0x13   : > { %377 = vadd.xlane.f32.xlu0 %v376_v4  ;;  %374 = vadd.xlane.f32.xlu1 %v373_v5  ;;  %v380_v10 = vmul.f32 32.0, %v988_v9  ;;  %vm384_vm1 = vweird.f32 %v988_v9 }
  0x15   : > { %v381_v11 = vsub.f32 1.0, %v380_v10 }
  0x17   : > { %v382_v12 = vmul.f32 %v988_v9, %v381_v11 }
  0x19   : > { %v383_v13 = vadd.f32 %v988_v9, %v382_v12 }
  0x1b   : > { %371 = vadd.xlane.f32.xlu0 %v370_v7  ;;  %v1101_v14 = vsel %vm384_vm1, %v988_v9, %v383_v13 }
  0x86   : > { %v378_v15 = vpop.xlane.xlu0 %377  ;;  %v375_v19 = vpop.xlane.xlu1 %374 }
  0x87   : > { %v388_v16 = vmul.f32 %v1101_v14, %v378_v15  ;;  %v387_v23 = vmul.f32 %v1101_v14, %v375_v19 }
  0x89   : > { %v391_v17 = vsub.f32 %v1089_v2, %v388_v16  ;;  %v1110_v25 = vsub.f32 %v1091_v3, %v387_v23  ;;  %v460_v23 = vld [vmem:[%s1230_s3 + $0x8] sm:$0xf] }
  0x8b   : > { %v394_v18 = vmul.f32 %v391_v17, %v391_v17  ;;  %v393_v28 = vmul.f32 %v1110_v25, %v1110_v25 }
  0x8d   : > { %v401_v20 = vsel %vm369_vm0, %v394_v18, 0.0  ;;  %v398_v29 = vsel %vm369_vm0, %v393_v28, 0.0  ;;  %v894_v28 = vld [vmem:[%s1230_s3 + $0x14] sm:$0xf] }
  0x8e   : > { %402 = vadd.xlane.f32.xlu1 %v401_v20  ;;  %v372_v21 = vpop.xlane.xlu0 %371 }
  0x8f   : > { %v386_v22 = vmul.f32 %v1101_v14, %v372_v21 }
  0x91   : > { %v389_v24 = vsub.f32 %v1097_v6, %v386_v22  ;;  %v945_v22 = vld [vmem:[%s1230_s3] sm:$0xff] }
  0x93   : > { %v392_v26 = vmul.f32 %v389_v24, %v389_v24 }
  0x95   : > { %v395_v27 = vsel %vm369_vm0, %v392_v26, 0.0  ;;  %v946_v26 = vld [vmem:[%s1230_s3 + $0xc] sm:$0xff] }
  0x96   : > { %396 = vadd.xlane.f32.xlu2 %v395_v27 }
  0x9e   : > { %399 = vadd.xlane.f32.xlu2 %v398_v29  ;;  %v516_v29 = vunpack.c.l.b16 %v894_v28 }
 0x101   : > { %v403_v30 = vpop.xlane.xlu1 %402 }
 0x102   : > { %v406_v31 = vmul.f32 %v403_v30, %v1101_v14  ;;  %v518_v30 = vpack.c.b16 %v516_v29, %v516_v29 }
 0x104   : > { %v409_v32 = vadd.f32 1e-05, %v406_v31 }
 0x106   : > { %989 = vrsqrt.f32 %v409_v32  ;;  %vm436_vm3 = vweird.f32 %v409_v32 }
 0x109   : > { %v397_v33 = vpop.xlane.xlu2 %396 }
 0x10a   : > { %v404_v34 = vmul.f32 %v397_v33, %v1101_v14 }
 0x10c   : > { %v990_v35 = vpop.eup %989  ;;  %v407_v36 = vadd.f32 1e-05, %v404_v34 }
 0x10d   : > { %v431_v37 = vmul.f32 %v990_v35, %v409_v32  ;;  %vm437_vm2 = vweird.f32 %v990_v35 }
 0x10e   : > { %991 = vrsqrt.f32 %v407_v36  ;;  %vm438_vm4 = vmor %vm436_vm3, %vm437_vm2  ;;  %vm416_vm6 = vweird.f32 %v407_v36 }
 0x10f   : > { %v432_v38 = vmul.f32 %v990_v35, %v431_v37 }
 0x111   : > { %v433_v39 = vmul.f32 0.5, %v432_v38  ;;  %v400_v40 = vpop.xlane.xlu2 %399 }
 0x112   : > { %v405_v41 = vmul.f32 %v400_v40, %v1101_v14 }
 0x113   : > { %v434_v42 = vsub.f32 1.5, %v433_v39 }
 0x114   : > { %v992_v43 = vpop.eup %991  ;;  %v408_v44 = vadd.f32 1e-05, %v405_v41 }
 0x115   : > { %v435_v45 = vmul.f32 %v990_v35, %v434_v42  ;;  %v411_v46 = vmul.f32 %v992_v43, %v407_v36  ;;  %vm417_vm5 = vweird.f32 %v992_v43 }
 0x116   : > { %993 = vrsqrt.f32 %v408_v44  ;;  %vm418_vm7 = vmor %vm416_vm6, %vm417_vm5  ;;  %vm426_vm10 = vweird.f32 %v408_v44 }
 0x117   : > { %v439_v48 = vsel %vm438_vm4, %v990_v35, %v435_v45  ;;  %v412_v49 = vmul.f32 %v992_v43, %v411_v46 }
 0x118   : > { %v442_v50 = vmul.f32 %v439_v48, %v391_v17 }
 0x119   : > { %v413_v52 = vmul.f32 0.5, %v412_v49 }
 0x11a   : > { %v448_v53 = vmul.f32 %v981_v47, %v442_v50 }
 0x11b   : > { %v414_v54 = vsub.f32 1.5, %v413_v52 }
 0x11c   : > { %v994_v55 = vpop.eup %993  ;;  %v454_v56 = vadd.f32 %v982_v51, %v448_v53 }
 0x11d   : > { %v415_v57 = vmul.f32 %v992_v43, %v414_v54  ;;  %v421_v58 = vmul.f32 %v994_v55, %v408_v44  ;;  %vm427_vm9 = vweird.f32 %v994_v55 }
 0x11e   : > { %v457_v59 = vpack.c.bf16 %v454_v56, %v454_v56  ;;  %vm428_vm11 = vmor %vm426_vm10, %vm427_vm9 }
 0x11f   : > { %v419_v60 = vsel %vm418_vm7, %v992_v43, %v415_v57  ;;  %v422_v61 = vmul.f32 %v994_v55, %v421_v58 }
 0x120   : > { %v440_v62 = vmul.f32 %v419_v60, %v389_v24  ;;  %v474_v63 = vunpack.c.l.b16 %v457_v59  ;;  %v466_v24 = vunpack.c.l.b16 %v460_v23 }
 0x121   : > { %v423_v0 = vmul.f32 0.5, %v422_v61 }
 0x122   : > { %v476_v1 = vpack.c.b16 %v474_v63, %v474_v63  ;;  %v446_v7 = vmul.f32 %v981_v47, %v440_v62  ;;  %v468_v27 = vpack.c.b16 %v466_v24, %v466_v24 }
 0x123   : > { %v424_v4 = vsub.f32 1.5, %v423_v0 }
 0x124   : > { %521 = vrot.lane.b32.xlu0 %v476_v1, %s1016_s23  ;;  %v487_v5 = vsel %vm485_vm8, %v476_v1, 0  ;;  %v452_v11 = vadd.f32 %v982_v51, %v446_v7  ;;  %v947_v7 = vld [vmem:[%s1233_s6] sm:$0xff] }
 0x125   : > { %v425_v8 = vmul.f32 %v994_v55, %v424_v4  ;;  %495 = vmatpush.bf16.msra.mxu0 %v487_v5  ;;  %v948_v5 = vld [vmem:[%s1233_s6 + $0x8] sm:$0xff] }
 0x126   : > { %v455_v15 = vpack.c.bf16 %v452_v11, %v452_v11  ;;  %684 = vmatpush.bf16.msra.mxu2 %v948_v5 }
 0x127   : > { %v429_v9 = vsel %vm428_vm11, %v994_v55, %v425_v8 }
 0x128   : > { %v441_v10 = vmul.f32 %v429_v9, %v1110_v25  ;;  %v472_v17 = vunpack.c.l.b16 %v455_v15 }
 0x12a   : > { %v447_v12 = vmul.f32 %v981_v47, %v441_v10  ;;  %685 = vmatpush.bf16.msra.mxu2 %v947_v7 }
 0x12c   : > { %v453_v13 = vadd.f32 %v982_v51, %v447_v12 }
 0x12e   : > { %v456_v16 = vpack.c.bf16 %v453_v13, %v453_v13 }
 0x130   : > { %v473_v18 = vunpack.c.l.b16 %v456_v16 }
 0x132   : > { %v475_v19 = vpack.c.b16 %v473_v18, %v472_v17 }
 0x134   : > { %519 = vrot.lane.b32.xlu1 %v475_v19, %s1016_s23  ;;  %496 = vmatpush.bf16.msra.mxu0 %v475_v19 }
 0x137   : > { %890 = vmatmul.msk.bf16.vlgmr.msra.gmra.mxu0 %vm478_vm12, %v945_v22 }
 0x147   : > { %891 = vmatmul.msk.bf16.gmra.mxu0 %vm478_vm12, %v468_v27 }
 0x196   : > { %v522_v20 = vpop.permute.xlu0 %521 }
 0x197   : > { %v531_v21 = vsel %vm485_vm8, %v522_v20, 0 }
 0x198   : > { %539 = vmatpush.bf16.msra.mxu1 %v531_v21 }
 0x1a6   : > { %v520_v25 = vpop.permute.xlu1 %519 }
 0x1a7   : > { %540 = vmatpush.bf16.msra.mxu1 %v520_v25 }
 0x1aa   : > { %899 = vmatmul.msk.bf16.vlgmr.msra.gmra.mxu1 %vm478_vm12, %v946_v26 }
 0x1b4   : > { %v498_v35 = vpop.f32.mrf.mxu0 }
 0x1ba   : > { %900 = vmatmul.msk.bf16.gmra.mxu1 %vm478_vm12, %v518_v30  ;;  %v983_v30 = vld [vmem:[%s1231_s4] ss:$0 sm:$0xff] }
 0x1bc   : > { %v500_v36 = vpop.f32.mrf.mxu0 }
 0x1c4   : > { %v503_v37 = vpop.f32.mrf.mxu0 }
 0x1cc   : > { %v505_v38 = vpop.f32.mrf.mxu0 }
 0x227   : > { %v542_v31 = vpop.f32.mrf.mxu1 }
 0x228   : > { %554 = vrot.lane.b32.xlu2 %v542_v31, %s1017_s12 }
 0x22f   : > { %v544_v32 = vpop.f32.mrf.mxu1 }
 0x230   : > { %556 = vrot.lane.b32.xlu0 %v544_v32, %s1017_s12 }
 0x237   : > { %v547_v33 = vpop.f32.mrf.mxu1 }
 0x238   : > { %558 = vrot.lane.b32.xlu2 %v547_v33, %s1017_s12 }
 0x23f   : > { %v549_v34 = vpop.f32.mrf.mxu1 }
 0x282   : > { %v555_v39 = vpop.permute.xlu2 %554 }
 0x283   : > { %v564_v40 = vsel %vm563_vm13, %v498_v35, %v555_v39 }
 0x284   : > { %v1141_v41 = vadd.f32 %v1097_v6, %v564_v40 }
 0x286   : > { %v572_v42 = vsel %vm369_vm0, %v1141_v41, 0.0 }
 0x287   : > { %573 = vadd.xlane.f32.xlu1 %v572_v42 }
 0x292   : > { %v559_v43 = vpop.permute.xlu2 %558 }
 0x293   : > { %v566_v44 = vsel %vm563_vm13, %v503_v37, %v559_v43 }
 0x294   : > { %v1146_v45 = vadd.f32 %v566_v44, %v1089_v2 }
 0x296   : > { %v578_v46 = vsel %vm369_vm0, %v1146_v45, 0.0 }
 0x297   : > { %579 = vadd.xlane.f32.xlu2 %v578_v46 }
 0x2a2   : > { %v557_v47 = vpop.permute.xlu0 %556 }
 0x2a3   : > { %v565_v48 = vsel %vm563_vm13, %v500_v36, %v557_v47  ;;  %v984_v36 = vld [vmem:[%s1232_s5] ss:$0 sm:$0xff] }
 0x2a4   : > { %v1151_v49 = vadd.f32 %v1091_v3, %v565_v48 }
 0x2a6   : > { %v575_v6 = vsel %vm369_vm0, %v1151_v49, 0.0 }
 0x2a7   : > { %576 = vadd.xlane.f32.xlu0 %v575_v6  ;;  %v956_v6 = vld [vmem:[%s1235_s8 + $0x38] sm:$0xff] }
 0x2a8   : > { %789 = vmatpush.bf16.msrb.mxu0 %v956_v6  ;;  %961 = vmatpush.bf16.msra.mxu3 %v956_v6 }
 0x2fa   : > { %v574_v50 = vpop.xlane.xlu1 %573 }
 0x2fb   : > { %v581_v51 = vmul.f32 %v574_v50, %v1101_v14  ;;  %v955_v50 = vld [vmem:[%s1235_s8 + $0x30] sm:$0xff] }
 0x2fc   : > { %790 = vmatpush.bf16.msrb.mxu0 %v955_v50  ;;  %962 = vmatpush.bf16.msra.mxu3 %v955_v50 }
 0x2fd   : > { %v584_v52 = vsub.f32 %v1141_v41, %v581_v51  ;;  %v954_v51 = vld [vmem:[%s1235_s8 + $0x28] sm:$0xff] }
 0x2ff   : > { %v587_v2 = vmul.f32 %v584_v52, %v584_v52 }
 0x300   : > { %791 = vmatpush.bf16.msrb.mxu0 %v954_v51  ;;  %963 = vmatpush.bf16.msra.mxu3 %v954_v51 }
 0x301   : > { %v590_v53 = vsel %vm369_vm0, %v587_v2, 0.0  ;;  %v952_v2 = vld [vmem:[%s1235_s8 + $0x18] sm:$0xff] }
 0x302   : > { %591 = vadd.xlane.f32.xlu1 %v590_v53  ;;  %v951_v53 = vld [vmem:[%s1235_s8 + $0x10] sm:$0xff] }
 0x30a   : > { %v580_v54 = vpop.xlane.xlu2 %579 }
 0x30b   : > { %v583_v55 = vmul.f32 %v580_v54, %v1101_v14  ;;  %v950_v54 = vld [vmem:[%s1235_s8 + $0x8] sm:$0xff] }
 0x30d   : > { %v1160_v56 = vsub.f32 %v1146_v45, %v583_v55  ;;  %v985_v55 = vld [vmem:[%s1234_s7] ss:$0 sm:$0xff] }
 0x30f   : > { %v589_v3 = vmul.f32 %v1160_v56, %v1160_v56 }
 0x311   : > { %v596_v57 = vsel %vm369_vm0, %v589_v3, 0.0 }
 0x312   : > { %597 = vadd.xlane.f32.xlu2 %v596_v57 }
 0x31a   : > { %v577_v58 = vpop.xlane.xlu0 %576 }
 0x31b   : > { %v582_v59 = vmul.f32 %v577_v58, %v1101_v14 }
 0x31d   : > { %v585_v60 = vsub.f32 %v1151_v49, %v582_v59 }
 0x31f   : > { %v588_v61 = vmul.f32 %v585_v60, %v585_v60 }
 0x321   : > { %v593_v62 = vsel %vm369_vm0, %v588_v61, 0.0 }
 0x322   : > { %594 = vadd.xlane.f32.xlu0 %v593_v62 }
 0x375   : > { %v592_v63 = vpop.xlane.xlu1 %591 }
 0x376   : > { %v599_v0 = vmul.f32 %v592_v63, %v1101_v14 }
 0x378   : > { %v602_v1 = vadd.f32 1e-05, %v599_v0 }
 0x37a   : > { %995 = vrsqrt.f32 %v602_v1  ;;  %vm611_vm15 = vweird.f32 %v602_v1 }
 0x380   : > { %v996_v8 = vpop.eup %995 }
 0x381   : > { %v606_v10 = vmul.f32 %v996_v8, %v602_v1  ;;  %vm612_vm14 = vweird.f32 %v996_v8 }
 0x382   : > { %vm613_vm1 = vmor %vm611_vm15, %vm612_vm14 }
 0x383   : > { %v607_v12 = vmul.f32 %v996_v8, %v606_v10 }
 0x385   : > { %v598_v4 = vpop.xlane.xlu2 %597  ;;  %v608_v17 = vmul.f32 0.5, %v607_v12 }
 0x386   : > { %v601_v9 = vmul.f32 %v598_v4, %v1101_v14 }
 0x387   : > { %v609_v19 = vsub.f32 1.5, %v608_v17 }
 0x388   : > { %v604_v11 = vadd.f32 1e-05, %v601_v9 }
 0x389   : > { %v610_v22 = vmul.f32 %v996_v8, %v609_v19 }
 0x38a   : > { %997 = vrsqrt.f32 %v604_v11  ;;  %vm631_vm6 = vweird.f32 %v604_v11 }
 0x38b   : > { %v614_v26 = vsel %vm613_vm1, %v996_v8, %v610_v22 }
 0x390   : > { %v998_v18 = vpop.eup %997 }
 0x391   : > { %v626_v20 = vmul.f32 %v998_v18, %v604_v11  ;;  %vm632_vm5 = vweird.f32 %v998_v18 }
 0x392   : > { %vm633_vm7 = vmor %vm631_vm6, %vm632_vm5 }
 0x393   : > { %v627_v24 = vmul.f32 %v998_v18, %v626_v20 }
 0x395   : > { %v595_v13 = vpop.xlane.xlu0 %594  ;;  %v628_v28 = vmul.f32 0.5, %v627_v24 }
 0x396   : > { %v600_v15 = vmul.f32 %v595_v13, %v1101_v14  ;;  %v635_v14 = vmul.f32 %v614_v26, %v584_v52  ;;  %v953_v52 = vld [vmem:[%s1235_s8 + $0x20] sm:$0xff] }
 0x397   : > { %v629_v32 = vsub.f32 1.5, %v628_v28  ;;  %792 = vmatpush.bf16.msrb.mxu0 %v953_v52  ;;  %964 = vmatpush.bf16.msra.mxu3 %v953_v52 }
 0x398   : > { %v603_v16 = vadd.f32 1e-05, %v600_v15  ;;  %v641_v35 = vmul.f32 %v983_v30, %v635_v14 }
 0x399   : > { %v630_v38 = vmul.f32 %v998_v18, %v629_v32 }
 0x39a   : > { %999 = vrsqrt.f32 %v603_v16  ;;  %vm621_vm3 = vweird.f32 %v603_v16  ;;  %v647_v39 = vadd.f32 %v984_v36, %v641_v35 }
 0x39b   : > { %v634_v43 = vsel %vm633_vm7, %v998_v18, %v630_v38  ;;  %793 = vmatpush.bf16.msrb.mxu0 %v952_v2  ;;  %965 = vmatpush.bf16.msra.mxu3 %v952_v2 }
 0x39c   : > { %v637_v44 = vmul.f32 %v634_v43, %v1160_v56  ;;  %v949_v56 = vld [vmem:[%s1235_s8] sm:$0xff] }
 0x39e   : > { %v643_v46 = vmul.f32 %v983_v30, %v637_v44 }
 0x39f   : > { %794 = vmatpush.bf16.msrb.mxu0 %v951_v53  ;;  %966 = vmatpush.bf16.msra.mxu3 %v951_v53 }
 0x3a0   : > { %v1000_v21 = vpop.eup %999  ;;  %v649_v47 = vadd.f32 %v984_v36, %v643_v46 }
 0x3a1   : > { %v616_v23 = vmul.f32 %v1000_v21, %v603_v16  ;;  %vm622_vm2 = vweird.f32 %v1000_v21 }
 0x3a2   : > { %vm623_vm4 = vmor %vm621_vm3, %vm622_vm2  ;;  %v651_v48 = vpack.c.bf16 %v649_v47, %v649_v47 }
 0x3a3   : > { %v617_v25 = vmul.f32 %v1000_v21, %v616_v23  ;;  %795 = vmatpush.bf16.msrb.mxu0 %v950_v54  ;;  %967 = vmatpush.bf16.msra.mxu3 %v950_v54 }
 0x3a5   : > { %v618_v27 = vmul.f32 0.5, %v617_v25 }
 0x3a7   : > { %v619_v29 = vsub.f32 1.5, %v618_v27  ;;  %796 = vmatpush.bf16.msrb.mxu0 %v949_v56  ;;  %968 = vmatpush.bf16.msra.mxu3 %v949_v56 }
 0x3a9   : > { %v620_v31 = vmul.f32 %v1000_v21, %v619_v29 }
 0x3ab   : > { %v624_v33 = vsel %vm623_vm4, %v1000_v21, %v620_v31  ;;  %v986_v31 = vld [vmem:[%s1236_s9] ss:$0 sm:$0xff] }
 0x3ac   : > { %v636_v34 = vmul.f32 %v624_v33, %v585_v60 }
 0x3ae   : > { %v642_v37 = vmul.f32 %v983_v30, %v636_v34 }
 0x3b0   : > { %v648_v40 = vadd.f32 %v984_v36, %v642_v37 }
 0x3b2   : > { %v650_v42 = vpack.c.bf16 %v648_v40, %v647_v39 }
 0x3b4   : > { %909 = vmatmul.msk.bf16.vlgmr.msra.gmra.mxu2 %vm369_vm0, %v650_v42 }
 0x3c4   : > { %910 = vmatmul.msk.bf16.gmra.mxu2 %vm369_vm0, %v651_v48  ;;  %vm820_vm0 = vcmask 257024  }
 0x437   : > { %v687_v3 = vpop.f32.mrf.mxu2 }
 0x438   : > { %v688_v57 = vadd.f32 %v985_v55, %v687_v3 }
 0x43a   : > { %v696_v58 = vmul.f32 %v688_v57, %v688_v57 }
 0x43c   : > { %v699_v59 = vmul.f32 %v696_v58, %v688_v57 }
 0x43e   : > { %v702_v60 = vmul.f32 0.044715, %v699_v59 }
 0x43f   : > { %v689_v61 = vpop.f32.mrf.mxu2 }
 0x440   : > { %v705_v62 = vadd.f32 %v702_v60, %v688_v57  ;;  %v690_v63 = vadd.f32 %v985_v55, %v689_v61 }
 0x442   : > { %v708_v0 = vmul.f32 0.7978846, %v705_v62  ;;  %v697_v1 = vmul.f32 %v690_v63, %v690_v63 }
 0x444   : > { %v700_v4 = vmul.f32 %v697_v1, %v690_v63  ;;  %1001 = vtanh.f32 %v708_v0 }
 0x446   : > { %v703_v5 = vmul.f32 0.044715, %v700_v4 }
 0x447   : > { %v692_v7 = vpop.f32.mrf.mxu2 }
 0x448   : > { %v706_v8 = vadd.f32 %v703_v5, %v690_v63  ;;  %v693_v9 = vadd.f32 %v985_v55, %v692_v7 }
 0x44a   : > { %v709_v10 = vmul.f32 0.7978846, %v706_v8  ;;  %v698_v11 = vmul.f32 %v693_v9, %v693_v9  ;;  %v1002_v12 = vpop.eup %1001 }
 0x44b   : > { %v714_v17 = vadd.f32 1.0, %v1002_v12 }
 0x44c   : > { %1003 = vtanh.f32 %v709_v10  ;;  %v701_v13 = vmul.f32 %v698_v11, %v693_v9 }
 0x44d   : > { %v717_v22 = vmul.f32 0.5, %v714_v17 }
 0x44e   : > { %v704_v15 = vmul.f32 0.044715, %v701_v13 }
 0x44f   : > { %v694_v16 = vpop.f32.mrf.mxu2  ;;  %v720_v24 = vmul.f32 %v717_v22, %v688_v57 }
 0x450   : > { %v707_v18 = vadd.f32 %v704_v15, %v693_v9 }
 0x452   : > { %v1004_v19 = vpop.eup %1003  ;;  %v710_v20 = vmul.f32 0.7978846, %v707_v18 }
 0x453   : > { %v715_v21 = vadd.f32 1.0, %v1004_v19 }
 0x454   : > { %1005 = vtanh.f32 %v710_v20 }
 0x455   : > { %v718_v23 = vmul.f32 0.5, %v715_v21 }
 0x457   : > { %v721_v25 = vmul.f32 %v718_v23, %v690_v63 }
 0x459   : > { %v723_v26 = vpack.c.bf16 %v721_v25, %v720_v24 }
 0x45a   : > { %v1006_v27 = vpop.eup %1005 }
 0x45b   : > { %797 = vmatmul.bf16.vlgmr.msrb.gmra.mxu0 %v723_v26  ;;  %v716_v28 = vadd.f32 1.0, %v1006_v27 }
 0x45d   : > { %v719_v29 = vmul.f32 0.5, %v716_v28 }
 0x45f   : > { %v722_v14 = vmul.f32 %v719_v29, %v693_v9 }
 0x461   : > { %v724_v30 = vpack.c.bf16 %v722_v14, %v722_v14 }
 0x463   : > { %802 = vmatmul.bf16.vlgmr.msra.gmra.mxu3 %v724_v30 }
 0x4d8   : > { %v798_v32 = vpop.f32.mrf.mxu0 }
 0x4d9   : > { %v807_v33 = vadd.f32 %v798_v32, %v1141_v41 }
 0x4db   : > { %v814_v34 = vadd.f32 %v986_v31, %v807_v33 }
 0x4dd   : > { %v817_v35 = vpack.c.bf16 %v814_v34, %v814_v34 }
 0x4df   : > { %821 = vst.msk [vmem:[%s359_s29] sm:$0xf] %vm820_vm0, %v817_v35 }
 0x4e0   : > { %v800_v36 = vpop.f32.mrf.mxu0 }
 0x4e1   : > { %v808_v37 = vadd.f32 %v800_v36, %v1151_v49 }
 0x4e3   : > { %v815_v38 = vadd.f32 %v986_v31, %v808_v37 }
 0x4e5   : > { %v818_v39 = vpack.c.bf16 %v815_v38, %v815_v38 }
 0x4e6   : > { %v803_v40 = vpop.f32.mrf.mxu3 }
 0x4e7   : > { %822 = vst.msk [vmem:[%s359_s29 + $0x4] sm:$0xf] %vm820_vm0, %v818_v39  ;;  %v809_v42 = vadd.f32 %v803_v40, %v1146_v45 }
 0x4e9   : > { %v816_v43 = vadd.f32 %v986_v31, %v809_v42 }
 0x4eb   : > { %v819_v41 = vpack.c.bf16 %v816_v43, %v816_v43 }
 0x4ed   : > { %823 = vst.msk [vmem:[%s359_s29 + $0x8] sm:$0xf] %vm820_vm0, %v819_v41 }
 0x4ee   : > { %v805_v44 = vpop.f32.mrf.mxu3 }
 0x4ef PF: > { %s20_s13 = sadd.s32 1, %s1013_s13  }
 0x4f0   : > { %p17_p4 = scmp.ge.s32.totalorder %s20_s13, 4  }
 0x4f2   :  { %19 = sbr.rel (!%p17_p4) target bundleno = 1 (0x1), region = 91 }

</bundles_post_ra>
